<compile_context>
chip_gen: v7x
topology: tpu7x:2x2x1
jax: 0.10.0
libtpu: 0.0.40
codegen_flags: <defaults>
</compile_context>

<pallas_src>
import jax
import jax.numpy as jnp
from jax import lax
from jax.experimental import pallas as pl
from jax.experimental.pallas import tpu as pltpu


def _fused_heads_kernel(b_ref, xpu_ref, xdv_ref, xbv_ref,
                        wpu_ref, wdv_ref, wbv_ref, o_ref):
    """One batch tile: three 1-output linear heads + bias + leaky_relu.

    Each head: (1, D) x (rows, D) -> (1, rows) on the MXU (lane-major result),
    packed into one (3, rows) value and written with a single store.
    """

    def head(x_ref, w_ref, bias):
        x = x_ref[...].astype(jnp.float32)          # (rows, D)
        w = w_ref[...].astype(jnp.float32)          # (1, D)
        y = lax.dot_general(
            w, x, (((1,), (1,)), ((), ())),
            preferred_element_type=jnp.float32,
            precision=lax.Precision.HIGHEST)        # f32-accurate; kernel is HBM-bound
        y = y + bias                                 # scalar bias from SMEM
        return jnp.where(y >= 0.0, y, 0.01 * y)      # leaky_relu, slope 0.01

    out = jnp.concatenate(
        [head(xpu_ref, wpu_ref, b_ref[0]),
         head(xdv_ref, wdv_ref, b_ref[1]),
         head(xbv_ref, wbv_ref, b_ref[2])],
        axis=0)                                      # (3, rows)
    o_ref[...] = out.astype(o_ref.dtype)


def _round_up(x, m):
    return ((x + m - 1) // m) * m


def _choose_tile_rows(batch, bytes_per_row, max_tile_rows=None):
    # Small batch: single tile whose block shape equals the full array shape
    # (no (8,128) divisibility constraint applies, no padding needed).
    if batch <= 256:
        return batch
    # Keep the double-buffered input footprint per step around <= 20 MiB; an
    # explicit 48 MiB vmem_limit keeps this safe on v5e/v6e and v7x (64 MiB).
    budget = 20 * 1024 * 1024
    rows = budget // max(1, 2 * bytes_per_row)
    rows = int(min(max(rows, 128), 4096))
    rows = (rows // 128) * 128
    if max_tile_rows is not None:
        rows = min(rows, max(128, (max_tile_rows // 128) * 128))
    # Guarantee >= 2 grid steps so the "parallel" batch axis can shard across
    # the two TensorCores on v7x.
    rows = min(rows, _round_up(pl.cdiv(batch, 2), 128))
    return max(rows, 128)


def model_pdbeta_forward(xs, params, *, max_tile_rows=None):
    """xs = (x_pu [B,2E], x_dv [B,2E], x_bv [B,E]); params dict of (w, b)."""
    x_pu, x_dv, x_bv = xs
    w_pu, b_pu = params["pu"]
    w_dv, b_dv = params["dv"]
    w_bv, b_bv = params["bv"]

    B = x_pu.shape[0]
    d_pu, d_dv, d_bv = x_pu.shape[1], x_dv.shape[1], x_bv.shape[1]
    out_dtype = jnp.result_type(x_pu.dtype, w_pu.dtype)

    # Actual input itemsize: the f32 upcast happens in vregs, not in the
    # pipelined VMEM buffers, so bf16 inputs allow 2x larger row tiles.
    in_itemsize = jnp.dtype(x_pu.dtype).itemsize
    tile = _choose_tile_rows(B, (d_pu + d_dv + d_bv) * in_itemsize, max_tile_rows)
    grid = (pl.cdiv(B, tile),)                      # no padding round-trip

    ws = (jnp.asarray(w_pu).reshape(1, d_pu),
          jnp.asarray(w_dv).reshape(1, d_dv),
          jnp.asarray(w_bv).reshape(1, d_bv))
    # nn.Linear biases have shape [1]; squeeze defensively to scalars.
    biases = jnp.stack([
        jnp.asarray(b_pu, jnp.float32).reshape(()),
        jnp.asarray(b_dv, jnp.float32).reshape(()),
        jnp.asarray(b_bv, jnp.float32).reshape(()),
    ])

    bytes_accessed = (
        B * (d_pu + d_dv + d_bv) * in_itemsize
        + sum(int(w.size) * w.dtype.itemsize for w in ws)
        + 3 * B * jnp.dtype(out_dtype).itemsize
    )
    cost = pl.CostEstimate(
        flops=2 * B * (d_pu + d_dv + d_bv),
        transcendentals=0,
        bytes_accessed=int(bytes_accessed),
    )

    packed = pl.pallas_call(
        _fused_heads_kernel,
        out_shape=jax.ShapeDtypeStruct((3, B), out_dtype),
        grid=grid,
        in_specs=[
            # all three (scalar) biases in one tiny 1-D SMEM array
            pl.BlockSpec((3,), lambda i: (0,),
                         memory_space=pltpu.MemorySpace.SMEM),
            # batch-tiled activations (double-buffered by the pipeline)
            pl.BlockSpec((tile, d_pu), lambda i: (i, 0)),
            pl.BlockSpec((tile, d_dv), lambda i: (i, 0)),
            pl.BlockSpec((tile, d_bv), lambda i: (i, 0)),
            # weights: constant index_map -> stay resident in VMEM
            pl.BlockSpec((1, d_pu), lambda i: (0, 0)),
            pl.BlockSpec((1, d_dv), lambda i: (0, 0)),
            pl.BlockSpec((1, d_bv), lambda i: (0, 0)),
        ],
        # lane-dense packed output: batch on the lane axis; partial last block
        # writes are masked by Pallas.
        out_specs=pl.BlockSpec((3, tile), lambda i: (0, i)),
        compiler_params=pltpu.CompilerParams(
            dimension_semantics=("parallel",),
            vmem_limit_bytes=48 * 1024 * 1024),
        cost_estimate=cost,
    )(biases, x_pu, x_dv, x_bv, *ws)

    return packed[0][:, None], packed[1][:, None], packed[2][:, None]


def _reference(xs, params):
    def lin(x, w, b):
        # exact f32 reference (VPU-style), matches nn.Linear + leaky_relu
        y = jnp.sum(x * jnp.asarray(w).reshape(1, -1), axis=-1, keepdims=True)
        y = y + jnp.asarray(b).reshape(())
        return jnp.where(y >= 0.0, y, 0.01 * y)
    return tuple(lin(x, *params[k]) for x, k in zip(xs, ("pu", "dv", "bv")))


if __name__ == "__main__":
    key = jax.random.PRNGKey(0)
    B, E = 8, 32           # batch, embedding_dim

    keys = jax.random.split(key, 9)

    # inputs (tuple of three tensors, as in the PyTorch forward)
    x_pu = jax.random.normal(keys[0], (B, 2 * E), jnp.float32)
    x_dv = jax.random.normal(keys[1], (B, 2 * E), jnp.float32)
    x_bv = jax.random.normal(keys[2], (B, E), jnp.float32)

    # deterministic parameter init (nn.Linear shapes: weight [1, in], bias [1])
    def init_linear(kw, kb, fan_in):
        bound = 1.0 / jnp.sqrt(fan_in)
        w = jax.random.uniform(kw, (1, fan_in), jnp.float32, -bound, bound)
        b = jax.random.uniform(kb, (1,), jnp.float32, -bound, bound)
        return w, b

    params = {
        "pu": init_linear(keys[3], keys[4], 2 * E),
        "dv": init_linear(keys[5], keys[6], 2 * E),
        "bv": init_linear(keys[7], keys[8], E),
    }

    # 1) Small single-tile case (matches the module's forward shapes).
    outs = jax.block_until_ready(model_pdbeta_forward((x_pu, x_dv, x_bv), params))
    refs = _reference((x_pu, x_dv, x_bv), params)
    for o, r in zip(outs, refs):
        assert o.shape == r.shape
        assert float(jnp.max(jnp.abs(o - r))) < 1e-3

    # 2) Larger batch not divisible by the tile: multi-step parallel grid with
    #    a partial (masked) last output block and no input padding.
    B2 = 300
    kx = jax.random.split(keys[0], 3)
    x2 = (jax.random.normal(kx[0], (B2, 2 * E), jnp.float32),
          jax.random.normal(kx[1], (B2, 2 * E), jnp.float32),
          jax.random.normal(kx[2], (B2, E), jnp.float32))
    outs2 = jax.block_until_ready(
        model_pdbeta_forward(x2, params, max_tile_rows=128))
    refs2 = _reference(x2, params)
    for o, r in zip(outs2, refs2):
        assert o.shape == r.shape
        assert float(jnp.max(jnp.abs(o - r))) < 1e-3

    print("KERNEL_OK")
</pallas_src>

<mosaic_0001>
module attributes {stable_mosaic.version = 11 : i64} {
  func.func @_fused_heads_kernel(%arg0: i32, %arg1: memref<3xf32, #tpu.memory_space<smem>>, %arg2: memref<8x64xf32, #tpu.memory_space<vmem>>, %arg3: memref<8x64xf32, #tpu.memory_space<vmem>>, %arg4: memref<8x32xf32, #tpu.memory_space<vmem>>, %arg5: memref<1x64xf32, #tpu.memory_space<vmem>>, %arg6: memref<1x64xf32, #tpu.memory_space<vmem>>, %arg7: memref<1x32xf32, #tpu.memory_space<vmem>>, %arg8: memref<3x8xf32, #tpu.memory_space<vmem>>) attributes {dimension_semantics = [#tpu.dimension_semantics<parallel>], iteration_bounds = array<i64: 1>, scalar_prefetch = 0 : i64, scratch_operands = 0 : i64, tpu.core_type = #tpu.core_type<tc>, window_params = [{transform_indices = @transform_0, window_bounds = array<i64: 3>}, {transform_indices = @transform_1, window_bounds = array<i64: 8, 64>}, {transform_indices = @transform_2, window_bounds = array<i64: 8, 64>}, {transform_indices = @transform_3, window_bounds = array<i64: 8, 32>}, {pipeline_mode = #tpu.pipeline_mode<synchronous>, transform_indices = @transform_4, window_bounds = array<i64: 1, 64>}, {pipeline_mode = #tpu.pipeline_mode<synchronous>, transform_indices = @transform_5, window_bounds = array<i64: 1, 64>}, {pipeline_mode = #tpu.pipeline_mode<synchronous>, transform_indices = @transform_6, window_bounds = array<i64: 1, 32>}, {transform_indices = @transform_7, window_bounds = array<i64: 3, 8>}]} {
    %c0 = arith.constant 0 : index
    %0 = memref.load %arg1[%c0] : memref<3xf32, #tpu.memory_space<smem>>
    %c0_0 = arith.constant 0 : index
    %c0_1 = arith.constant 0 : index
    %1 = vector.load %arg2[%c0_0, %c0_1] : memref<8x64xf32, #tpu.memory_space<vmem>>, vector<8x64xf32>
    %c0_2 = arith.constant 0 : index
    %c0_3 = arith.constant 0 : index
    %2 = vector.load %arg5[%c0_2, %c0_3] : memref<1x64xf32, #tpu.memory_space<vmem>>, vector<1x64xf32>
    %cst = arith.constant dense<0.000000e+00> : vector<1x8xf32>
    %3 = tpu.matmul %2, %1, %cst {dimension_numbers = #tpu.dot_dimension_numbers<[1], [1], [0], [0], [0, 0, 1, 0], [], []>, precision = #tpu.contract_precision<fp32>} : vector<1x64xf32>, vector<8x64xf32>, vector<1x8xf32> -> vector<1x8xf32>
    %4 = vector.broadcast %0 : f32 to vector<1x8xf32>
    %5 = arith.addf %3, %4 : vector<1x8xf32>
    %cst_4 = arith.constant 0.000000e+00 : f32
    %6 = vector.broadcast %cst_4 : f32 to vector<1x8xf32>
    %7 = arith.cmpf oge, %5, %6 : vector<1x8xf32>
    %cst_5 = arith.constant 0.00999999977 : f32
    %8 = vector.broadcast %cst_5 : f32 to vector<1x8xf32>
    %9 = arith.mulf %8, %5 : vector<1x8xf32>
    %10 = arith.select %7, %5, %9 : vector<1x8xi1>, vector<1x8xf32>
    %c1 = arith.constant 1 : index
    %11 = memref.load %arg1[%c1] : memref<3xf32, #tpu.memory_space<smem>>
    %c0_6 = arith.constant 0 : index
    %c0_7 = arith.constant 0 : index
    %12 = vector.load %arg3[%c0_6, %c0_7] : memref<8x64xf32, #tpu.memory_space<vmem>>, vector<8x64xf32>
    %c0_8 = arith.constant 0 : index
    %c0_9 = arith.constant 0 : index
    %13 = vector.load %arg6[%c0_8, %c0_9] : memref<1x64xf32, #tpu.memory_space<vmem>>, vector<1x64xf32>
    %cst_10 = arith.constant dense<0.000000e+00> : vector<1x8xf32>
    %14 = tpu.matmul %13, %12, %cst_10 {dimension_numbers = #tpu.dot_dimension_numbers<[1], [1], [0], [0], [0, 0, 1, 0], [], []>, precision = #tpu.contract_precision<fp32>} : vector<1x64xf32>, vector<8x64xf32>, vector<1x8xf32> -> vector<1x8xf32>
    %15 = vector.broadcast %11 : f32 to vector<1x8xf32>
    %16 = arith.addf %14, %15 : vector<1x8xf32>
    %cst_11 = arith.constant 0.000000e+00 : f32
    %17 = vector.broadcast %cst_11 : f32 to vector<1x8xf32>
    %18 = arith.cmpf oge, %16, %17 : vector<1x8xf32>
    %cst_12 = arith.constant 0.00999999977 : f32
    %19 = vector.broadcast %cst_12 : f32 to vector<1x8xf32>
    %20 = arith.mulf %19, %16 : vector<1x8xf32>
    %21 = arith.select %18, %16, %20 : vector<1x8xi1>, vector<1x8xf32>
    %c2 = arith.constant 2 : index
    %22 = memref.load %arg1[%c2] : memref<3xf32, #tpu.memory_space<smem>>
    %c0_13 = arith.constant 0 : index
    %c0_14 = arith.constant 0 : index
    %23 = vector.load %arg4[%c0_13, %c0_14] : memref<8x32xf32, #tpu.memory_space<vmem>>, vector<8x32xf32>
    %c0_15 = arith.constant 0 : index
    %c0_16 = arith.constant 0 : index
    %24 = vector.load %arg7[%c0_15, %c0_16] : memref<1x32xf32, #tpu.memory_space<vmem>>, vector<1x32xf32>
    %cst_17 = arith.constant dense<0.000000e+00> : vector<1x8xf32>
    %25 = tpu.matmul %24, %23, %cst_17 {dimension_numbers = #tpu.dot_dimension_numbers<[1], [1], [0], [0], [0, 0, 1, 0], [], []>, precision = #tpu.contract_precision<fp32>} : vector<1x32xf32>, vector<8x32xf32>, vector<1x8xf32> -> vector<1x8xf32>
    %26 = vector.broadcast %22 : f32 to vector<1x8xf32>
    %27 = arith.addf %25, %26 : vector<1x8xf32>
    %cst_18 = arith.constant 0.000000e+00 : f32
    %28 = vector.broadcast %cst_18 : f32 to vector<1x8xf32>
    %29 = arith.cmpf oge, %27, %28 : vector<1x8xf32>
    %cst_19 = arith.constant 0.00999999977 : f32
    %30 = vector.broadcast %cst_19 : f32 to vector<1x8xf32>
    %31 = arith.mulf %30, %27 : vector<1x8xf32>
    %32 = arith.select %29, %27, %31 : vector<1x8xi1>, vector<1x8xf32>
    %33 = tpu.concatenate %10, %21, %32 in 0 : vector<1x8xf32>, vector<1x8xf32>, vector<1x8xf32> -> vector<3x8xf32>
    %c0_20 = arith.constant 0 : index
    %c0_21 = arith.constant 0 : index
    %34 = vector.load %arg8[%c0_20, %c0_21] : memref<3x8xf32, #tpu.memory_space<vmem>>, vector<3x8xf32>
    tpu.vector_store %arg8[%c0_20, %c0_21], %33 {strides = array<i32>} : memref<3x8xf32, #tpu.memory_space<vmem>>, vector<3x8xf32>,
    return
  }
  func.func @transform_0(%arg0: i32) -> i32 {
    %c0_i32 = arith.constant 0 : i32
    %c0_i32_0 = arith.constant 0 : i32
    return %c0_i32 : i32
  }
  func.func @transform_1(%arg0: i32) -> (i32, i32) {
    %c0_i32 = arith.constant 0 : i32
    %c0_i32_0 = arith.constant 0 : i32
    return %arg0, %c0_i32 : i32, i32
  }
  func.func @transform_2(%arg0: i32) -> (i32, i32) {
    %c0_i32 = arith.constant 0 : i32
    %c0_i32_0 = arith.constant 0 : i32
    return %arg0, %c0_i32 : i32, i32
  }
  func.func @transform_3(%arg0: i32) -> (i32, i32) {
    %c0_i32 = arith.constant 0 : i32
    %c0_i32_0 = arith.constant 0 : i32
    return %arg0, %c0_i32 : i32, i32
  }
  func.func @transform_4(%arg0: i32) -> (i32, i32) {
    %c0_i32 = arith.constant 0 : i32
    %c0_i32_0 = arith.constant 0 : i32
    %c0_i32_1 = arith.constant 0 : i32
    return %c0_i32, %c0_i32_0 : i32, i32
  }
  func.func @transform_5(%arg0: i32) -> (i32, i32) {
    %c0_i32 = arith.constant 0 : i32
    %c0_i32_0 = arith.constant 0 : i32
    %c0_i32_1 = arith.constant 0 : i32
    return %c0_i32, %c0_i32_0 : i32, i32
  }
  func.func @transform_6(%arg0: i32) -> (i32, i32) {
    %c0_i32 = arith.constant 0 : i32
    %c0_i32_0 = arith.constant 0 : i32
    %c0_i32_1 = arith.constant 0 : i32
    return %c0_i32, %c0_i32_0 : i32, i32
  }
  func.func @transform_7(%arg0: i32) -> (i32, i32) {
    %c0_i32 = arith.constant 0 : i32
    %c0_i32_0 = arith.constant 0 : i32
    return %c0_i32, %arg0 : i32, i32
  }
}

</mosaic_0001>

<bundles_post_ra>
// kernel: tpu_custom_call.1
= control target key start
LH: loop header
LB: loop body
LE: loop exit
PB: predicated region body
PF: predicated region fallthrough
CT: control target
= control target key end

     0   :  { %12 = vsyncpa [#allocation5], 0  ;;  %s1908_s0 = inlined_call_operand.hbm [shape: f32[3], index: 0, kind: input, shape index: {}]   ;;  %s1909_s1 = inlined_call_operand.hbm [shape: f32[8,64], index: 1, kind: input, shape index: {}]   ;;  %s1910_s2 = inlined_call_operand.hbm [shape: f32[8,64], index: 2, kind: input, shape index: {}]   ;;  %s1911_s3 = inlined_call_operand.vmem [shape: f32[8,32], index: 3, kind: input, shape index: {}]   ;;  %s1912_s4 = inlined_call_operand.vmem [shape: f32[1,64], index: 4, kind: input, shape index: {}]   ;;  %s1913_s5 = inlined_call_operand.vmem [shape: f32[1,64], index: 5, kind: input, shape index: {}]   ;;  %s1914_s6 = inlined_call_operand.vmem [shape: f32[1,32], index: 6, kind: input, shape index: {}]   ;;  %s1915_s7 = inlined_call_operand.hbm [shape: f32[3,8], index: 7, kind: output, shape index: {}]  }
   0x1   :  { %13 = vsyncpa [#allocation3], 0 }
   0x2   :  { %14 = vsyncpa [#allocation8], 0 }
   0x3   :  { %15 = vsyncpa [#allocation4], 0  ;;  %s1636_s26 = scalar_lea.hbm %s1908_s0, 16 }
   0x4   :  { %p1637_p0 = scmp.ne.s32.totalorder %s1908_s0, %s1636_s26  ;;  %p1640_p1 = scmp.lt.u32.totalorder %s1636_s26, %s1908_s0 }
   0x6   :  { %p1642_p2 = pnand %p1640_p1, %p1637_p0 }
   0x8   :  { %1645 = shalt.err (!%p1642_p2)
}
   0x9   :  { %s1720_s8 = smov [#allocation2]   ;;  %s1721_s11 = smov [#allocation6]  }
   0xa   :  { %23 = dma.hbm_to_smem %s1908_s0, 16, %s1720_s8, [#allocation5]  }
   0xb   :  { %s30_s12 = sshll.u32 %s1721_s11, 4  ;;  %s1722_s13 = smov [#allocation7]   ;;  %s31_s12 = int_to_ptr.vmem [resolvable:$true] %s30_s12 }
   0xc   :  { %s40_s14 = sshll.u32 %s1722_s13, 4  ;;  %s1646_s17 = scalar_lea.hbm %s1909_s1, 128  ;;  %s41_s14 = int_to_ptr.vmem [resolvable:$true] %s40_s14 }
   0xd   :  { %p1647_p3 = scmp.ne.s32.totalorder %s1909_s1, %s1646_s17  ;;  %p1650_p4 = scmp.lt.u32.totalorder %s1646_s17, %s1909_s1 }
   0xf   :  { %p1652_p5 = pnand %p1650_p4, %p1647_p3 }
  0x11   :  { %1655 = shalt.err (!%p1652_p5)
}
  0x12   :  { %s1656_s0 = scalar_lea.vmem %s31_s12, 128  ;;  %p1661_p7 = scmp.lt.s32.totalorder %s31_s12, %s31_s12 }
  0x13   :  { %p1657_p6 = scmp.ne.s32.totalorder %s31_s12, %s1656_s0  ;;  %p1662_p8 = scmp.lt.s32.totalorder %s1656_s0, %s1656_s0 }
  0x15   :  { %p1663_p9 = por %p1662_p8, %p1661_p7 }
  0x17   :  { %p1664_p10 = pnand %p1663_p9, %p1657_p6 }
  0x19   :  { %1667 = shalt.err (!%p1664_p10)
}
  0x1a   :  { %33 = dma.hbm_to_vmem [thread:$0]  %s1909_s1, 128, %s31_s12, [#allocation3]  }
  0x1b   :  { %s1668_s26 = scalar_lea.hbm %s1910_s2, 128 }
  0x1c   :  { %p1669_p11 = scmp.ne.s32.totalorder %s1910_s2, %s1668_s26  ;;  %p1672_p12 = scmp.lt.u32.totalorder %s1668_s26, %s1910_s2 }
  0x1e   :  { %p1674_p13 = pnand %p1672_p12, %p1669_p11 }
  0x20   :  { %1677 = shalt.err (!%p1674_p13)
}
  0x21   :  { %s1678_s8 = scalar_lea.vmem %s41_s14, 128  ;;  %p1683_p1 = scmp.lt.s32.totalorder %s41_s14, %s41_s14 }
  0x22   :  { %p1679_p0 = scmp.ne.s32.totalorder %s41_s14, %s1678_s8  ;;  %p1684_p2 = scmp.lt.s32.totalorder %s1678_s8, %s1678_s8 }
  0x24   :  { %p1685_p3 = por %p1684_p2, %p1683_p1 }
  0x26   :  { %p1686_p4 = pnand %p1685_p3, %p1679_p0 }
  0x28   :  { %1689 = shalt.err (!%p1686_p4)
}
  0x29   :  { %43 = dma.hbm_to_vmem [thread:$0]  %s1910_s2, 128, %s41_s14, [#allocation8]  }
  0x2a   :  { %1712 = dma.done.wait [#allocation5], 16  }
  0x2b   :  { %1713 = vsyncadd [#allocation5], 4294967280 }
  0x2c   :  { %1714 = dma.done.wait [#allocation3], 128  }
  0x2d   :  { %1715 = vsyncadd [#allocation3], 4294967168 }
  0x2e   :  { %1716 = dma.done.wait [#allocation8], 128  }
  0x2f   :  { %1717 = vsyncadd [#allocation8], 4294967168 }
  0x30   :  { %61 = sfence }
  0x31   :  { %v63_v0 = vld [vmem:[#allocation6] sm:$0xff]  ;;  %vm66_vm0 = vcmask 523264   ;;  %v64_v1 = vld [vmem:[%s1912_s4] sm:$0x1]  ;;  %v1723_v2 = vmov 0.0   ;;  %vm1724_vm1 = vmmov 0  }
  0x32   :  { %1523 = vmatprep.subr.mxu0 %v1723_v2  ;;  %v71_v3 = vsel %vm66_vm0, %v63_v0, 0  ;;  %1508 = vmatprep.subr.mxu1 %v1723_v2  ;;  %v68_v4 = vsel %vm66_vm0, %v64_v1, 0  ;;  %v983_v7 = vld [vmem:[%s1914_s6] sm:$0x1]  ;;  %vm985_vm2 = vcmask 261120   ;;  %v523_v16 = vld [vmem:[#allocation7] sm:$0xff] }
  0x33   :  { %v74_v5 = vand.u32 4294901760, %v71_v3  ;;  %1525 = vmatprep.mubr.msk.f32.mxu0 %vm1724_vm1, %v1723_v2  ;;  %v139_v6 = vand.u32 4294901760, %v68_v4  ;;  %1510 = vmatprep.mubr.msk.f32.mxu1 %vm1724_vm1, %v1723_v2  ;;  %v982_v10 = vld [vmem:[%s1911_s3] sm:$0xff]  ;;  %v987_v11 = vsel %vm985_vm2, %v983_v7, 0  ;;  %v530_v24 = vsel %vm66_vm0, %v523_v16, 0  ;;  %s62_s3 = sld [smem:[#allocation2]] }
  0x34   :  { %v524_v14 = vld [vmem:[%s1913_s5] sm:$0x1]  ;;  %v990_v15 = vsel %vm985_vm2, %v982_v10, 0  ;;  %v1824_v19 = vand.u32 4294901760, %v987_v11  ;;  %v1838_v27 = vand.u32 4294901760, %v530_v24  ;;  %s1471_s5 = sld [smem:[#allocation2 + $0x2]] }
  0x35   :  { %v151_v8 = vsub.f32 %v71_v3, %v74_v5  ;;  %1524 = vmatpush3.xpose.msra.mxu0 %v74_v5  ;;  %1509 = vmatpush3.xpose.msra.mxu1 %v74_v5  ;;  %v140_v9 = vsub.f32 %v68_v4, %v139_v6  ;;  %v527_v20 = vsel %vm66_vm0, %v524_v14, 0  ;;  %v1830_v23 = vand.u32 4294901760, %v990_v15  ;;  %s1470_s6 = sld [smem:[#allocation2 + $0x1]]  ;;  %s1725_s16 = smov [#allocation9]  }
  0x36   :  { %1513 = vmatprep.subr.mxu1 %v1723_v2  ;;  %1528 = vmatprep.subr.mxu0 %v1723_v2  ;;  %v1059_v25 = vsub.f32 %v987_v11, %v1824_v19  ;;  %v1834_v26 = vand.u32 4294901760, %v527_v20  ;;  %v610_v31 = vsub.f32 %v530_v24, %v1838_v27  ;;  %vm1447_vm6 = vcmask 1040384   ;;  %s1459_s17 = sshll.u32 %s1725_s16, 4  ;;  %s1460_s17 = int_to_ptr.vmem [resolvable:$true] %s1459_s17 }
  0x37   :  { %v141_v12 = vand.u32 4294901760, %v140_v9  ;;  %v152_v13 = vand.u32 4294901760, %v151_v8  ;;  %v1070_v28 = vsub.f32 %v990_v15, %v1830_v23  ;;  %vm1449_vm7 = vcmask 1041408   ;;  %s1690_s18 = scalar_lea.vmem %s1460_s17, 64  ;;  %p1695_p6 = scmp.lt.s32.totalorder %s1460_s17, %s1460_s17 }
  0x38   :  { %v1060_v29 = vand.u32 4294901760, %v1059_v25  ;;  %v599_v30 = vsub.f32 %v527_v20, %v1834_v26  ;;  %v611_v35 = vand.u32 4294901760, %v610_v31  ;;  %vm1451_vm8 = vcmask 59392   ;;  %p1691_p5 = scmp.ne.s32.totalorder %s1460_s17, %s1690_s18  ;;  %p1696_p7 = scmp.lt.s32.totalorder %s1690_s18, %s1690_s18 }
  0x39   :  { %1526 = vmatmul.mubr.f32.vlgmr.msra.gmra.mrb[0].mxu0 %v141_v12  ;;  %v142_v17 = vsub.f32 %v140_v9, %v141_v12  ;;  %v153_v18 = vsub.f32 %v151_v8, %v152_v13  ;;  %v1071_v32 = vand.u32 4294901760, %v1070_v28  ;;  %v65_v45 = vstv %s62_s3 }
  0x3a   :  { %1529 = vmatpush3.xpose.msra.mxu0 %v152_v13  ;;  %1530 = vmatprep.mubr.msk.f32.mxu0 %vm1724_vm1, %v1723_v2  ;;  %v1061_v33 = vsub.f32 %v1059_v25, %v1060_v29  ;;  %v600_v34 = vand.u32 4294901760, %v599_v30  ;;  %v612_v39 = vsub.f32 %v610_v31, %v611_v35  ;;  %v984_v50 = vstv %s1471_s5  ;;  %p1697_p8 = por %p1696_p7, %p1695_p6 }
  0x3b   :  { %v143_v21 = vand.u32 4294901760, %v142_v17  ;;  %v154_v22 = vand.u32 4294901760, %v153_v18  ;;  %1533 = vmatprep.subr.mxu0 %v1723_v2  ;;  %v1072_v36 = vsub.f32 %v1070_v28, %v1071_v32  ;;  %v525_v54 = vstv %s1470_s6 }
  0x3c   :  { %v1062_v37 = vand.u32 4294901760, %v1061_v33  ;;  %v601_v38 = vsub.f32 %v599_v30, %v600_v34  ;;  %v613_v42 = vand.u32 4294901760, %v612_v39  ;;  %p1698_p9 = pnand %p1697_p8, %p1691_p5 }
  0x3d   :  { %1511 = vmatmul.mubr.f32.vlgmr.msra.gmra.mrb[0].mxu1 %v143_v21  ;;  %v1073_v40 = vand.u32 4294901760, %v1072_v36 }
  0x3e   :  { %1514 = vmatpush3.xpose.msra.mxu1 %v154_v22  ;;  %1515 = vmatprep.mubr.msk.f32.mxu1 %vm1724_vm1, %v1723_v2  ;;  %v602_v41 = vand.u32 4294901760, %v601_v38 }
  0x3f   :  { %1518 = vmatprep.subr.mxu1 %v1723_v2 }
  0x41   :  { %1531 = vmatmul.mubr.f32.vlgmr.msra.gmra.mrb[0].mxu0 %v139_v6 }
  0x42   :  { %1534 = vmatpush3.xpose.msra.mxu0 %v74_v5  ;;  %1535 = vmatprep.mubr.msk.f32.mxu0 %vm1724_vm1, %v1723_v2 }
  0x43   :  { %1568 = vmatprep.subr.mxu0 %v1723_v2 }
  0x45   :  { %1516 = vmatmul.mubr.f32.vlgmr.msra.gmra.mrb[0].mxu1 %v139_v6 }
  0x46   :  { %1519 = vmatpush3.xpose.msra.mxu1 %v151_v8  ;;  %1520 = vmatprep.mubr.msk.f32.mxu1 %vm1724_vm1, %v1723_v2 }
  0x47   :  { %1538 = vmatprep.subr.mxu1 %v1723_v2 }
  0x49   :  { %1536 = vmatmul.mubr.f32.vlgmr.msra.gmra.mrb[0].mxu0 %v139_v6 }
  0x4a   :  { %1569 = vmatpush3.xpose.msra.mxu0 %v1830_v23  ;;  %1570 = vmatprep.mubr.msk.f32.mxu0 %vm1724_vm1, %v1723_v2 }
  0x4b   :  { %1573 = vmatprep.subr.mxu0 %v1723_v2 }
  0x4d   :  { %1521 = vmatmul.mubr.f32.vlgmr.msra.gmra.mrb[0].mxu1 %v140_v9  ;;  %1571 = vmatmul.mubr.f32.vlgmr.msra.gmra.mrb[2].mxu0 %v1062_v37 }
  0x4e   :  { %1539 = vmatpush3.xpose.msra.mxu1 %v1838_v27  ;;  %1540 = vmatprep.mubr.msk.f32.mxu1 %vm1724_vm1, %v1723_v2 }
  0x4f   :  { %1543 = vmatprep.subr.mxu1 %v1723_v2  ;;  %1574 = vmatpush3.xpose.msra.mxu0 %v1073_v40 }
  0x50   :  { %1575 = vmatprep.mubr.msk.f32.mxu0 %vm1724_vm1, %v1723_v2  ;;  %1578 = vmatprep.subr.mxu0 %v1723_v2 }
  0x51   :  { %1541 = vmatmul.mubr.f32.vlgmr.msra.gmra.mrb[2].mxu1 %v602_v41 }
  0x52   :  { %1544 = vmatpush3.xpose.msra.mxu1 %v613_v42  ;;  %1545 = vmatprep.mubr.msk.f32.mxu1 %vm1724_vm1, %v1723_v2 }
  0x53   :  { %1548 = vmatprep.subr.mxu1 %v1723_v2 }
  0x55   :  { %1576 = vmatmul.mubr.f32.vlgmr.msra.gmra.mrb[2].mxu0 %v1824_v19 }
  0x56   :  { %1579 = vmatpush3.xpose.msra.mxu0 %v1070_v28  ;;  %1580 = vmatprep.mubr.msk.f32.mxu0 %vm1724_vm1, %v1723_v2 }
  0x57   :  { %1583 = vmatprep.subr.mxu0 %v1723_v2 }
  0x59   :  { %1546 = vmatmul.mubr.f32.vlgmr.msra.gmra.mrb[2].mxu1 %v1834_v26 }
  0x5a   :  { %1549 = vmatpush3.xpose.msra.mxu1 %v610_v31  ;;  %1550 = vmatprep.mubr.msk.f32.mxu1 %vm1724_vm1, %v1723_v2 }
  0x5b   :  { %1553 = vmatprep.subr.mxu1 %v1723_v2 }
  0x5d   :  { %1581 = vmatmul.mubr.f32.vlgmr.msra.gmra.mrb[2].mxu0 %v1059_v25 }
  0x5e   :  { %1584 = vmatpush3.xpose.msra.mxu0 %v1830_v23  ;;  %1585 = vmatprep.mubr.msk.f32.mxu0 %vm1724_vm1, %v1723_v2 }
  0x5f   :  { %1588 = vmatprep.subr.mxu0 %v1723_v2 }
  0x61   :  { %1551 = vmatmul.mubr.f32.vlgmr.msra.gmra.mrb[2].mxu1 %v599_v30 }
  0x62   :  { %1554 = vmatpush3.xpose.msra.mxu1 %v1838_v27  ;;  %1555 = vmatprep.mubr.msk.f32.mxu1 %vm1724_vm1, %v1723_v2 }
  0x63   :  { %1558 = vmatprep.subr.mxu1 %v1723_v2 }
  0x65   :  { %1586 = vmatmul.mubr.f32.vlgmr.msra.gmra.mrb[2].mxu0 %v1060_v29 }
  0x66   :  { %1589 = vmatpush3.xpose.msra.mxu0 %v1071_v32  ;;  %1590 = vmatprep.mubr.msk.f32.mxu0 %vm1724_vm1, %v1723_v2 }
  0x67   :  { %1593 = vmatprep.subr.mxu0 %v1723_v2 }
  0x69   :  { %1556 = vmatmul.mubr.f32.vlgmr.msra.gmra.mrb[2].mxu1 %v600_v34 }
  0x6a   :  { %1559 = vmatpush3.xpose.msra.mxu1 %v611_v35  ;;  %1560 = vmatprep.mubr.msk.f32.mxu1 %vm1724_vm1, %v1723_v2 }
  0x6b   :  { %1563 = vmatprep.subr.mxu1 %v1723_v2 }
  0x6d   :  { %1591 = vmatmul.mubr.f32.vlgmr.msra.gmra.mrb[2].mxu0 %v1824_v19 }
  0x6e   :  { %1594 = vmatpush3.xpose.msra.mxu0 %v1830_v23  ;;  %1595 = vmatprep.mubr.msk.f32.mxu0 %vm1724_vm1, %v1723_v2 }
  0x71   :  { %1561 = vmatmul.mubr.f32.vlgmr.msra.gmra.mrb[2].mxu1 %v1834_v26 }
  0x72   :  { %1564 = vmatpush3.xpose.msra.mxu1 %v1838_v27  ;;  %1565 = vmatprep.mubr.msk.f32.mxu1 %vm1724_vm1, %v1723_v2 }
  0x75   :  { %1596 = vmatmul.mubr.f32.vlgmr.msra.gmra.mrb[2].mxu0 %v1824_v19 }
  0x79   :  { %1566 = vmatmul.mubr.f32.vlgmr.msra.gmra.mrb[2].mxu1 %v1834_v26 }
 0x11c   :  { %v515_v43 = vpop.f32.mrb[0].mxu0 }
 0x11d   :  { %v1537_v44 = vpop.f32.mrb[1].mxu0 }
 0x120   :  { %v295_v46 = vpop.f32.mrb[0].mxu1 }
 0x121   :  { %v1598_v47 = vadd.f32 %v295_v46, %v65_v45  ;;  %v1522_v48 = vpop.f32.mrb[1].mxu1 }
 0x123   :  { %v1599_v49 = vadd.f32 %v1598_v47, %v515_v43 }
 0x125   :  { %v520_v59 = vmul.f32 0.01, %v1599_v49  ;;  %vm519_vm5 = vcmp.ge.f32.partialorder %v1599_v49, 0.0 }
 0x127   :  { %v521_v1 = vsel %vm519_vm5, %v1599_v49, %v520_v59 }
 0x148   :  { %v1434_v51 = vpop.f32.mrb[2].mxu0 }
 0x149   :  { %v1601_v52 = vadd.f32 %v1434_v51, %v984_v50  ;;  %v1597_v53 = vpop.f32.mrb[3].mxu0 }
 0x14b   :  { %v1439_v55 = vmul.f32 0.01, %v1601_v52  ;;  %vm1438_vm3 = vcmp.ge.f32.partialorder %v1601_v52, 0.0 }
 0x14c   :  { %v974_v56 = vpop.f32.mrb[2].mxu1 }
 0x14d   :  { %v1600_v57 = vadd.f32 %v974_v56, %v525_v54  ;;  %v1567_v58 = vpop.f32.mrb[3].mxu1  ;;  %v1440_v61 = vsel %vm1438_vm3, %v1601_v52, %v1439_v55 }
 0x14e   :  { %v1445_v0 = vrot.slane %v1440_v61, 6 }
 0x14f   :  { %vm978_vm4 = vcmp.ge.f32.partialorder %v1600_v57, 0.0  ;;  %v979_v60 = vmul.f32 0.01, %v1600_v57 }
 0x151   :  { %v980_v62 = vsel %vm978_vm4, %v1600_v57, %v979_v60 }
 0x152   :  { %v1442_v63 = vrot.slane %v980_v62, 7 }
 0x154   :  { %v1448_v2 = vsel %vm1447_vm6, %v521_v1, %v1442_v63 }
 0x155   :  { %v1450_v3 = vsel %vm1449_vm7, %v1448_v2, %v1445_v0 }
 0x156   :  { %1452 = vst.msk [vmem:[#allocation9] sm:$0x7] %vm1451_vm8, %v1450_v3 }
 0x157   :  { %1701 = shalt.err (!%p1698_p9)
}
 0x158   :  { %s1702_s21 = scalar_lea.hbm %s1915_s7, 64 }
 0x159   :  { %p1703_p10 = scmp.ne.s32.totalorder %s1915_s7, %s1702_s21  ;;  %p1706_p11 = scmp.lt.u32.totalorder %s1702_s21, %s1915_s7 }
 0x15b   :  { %p1708_p12 = pnand %p1706_p11, %p1703_p10 }
 0x15d   :  { %1711 = shalt.err (!%p1708_p12)
}
 0x15e   :  { %1462 = dma.vmem_to_hbm [thread:$0]  %s1460_s17, 64, %s1915_s7, [#allocation4]  }
 0x15f   :  { %1718 = dma.done.wait [#allocation4], 64  }
 0x160   :  { %1719 = vsyncadd [#allocation4], 4294967232 }
 0x161   :  { %1466 = vsyncpa [#allocation3], 1 }
 0x162   :  { %1467 = vsyncpa [#allocation8], 1 }
 0x163   :  { %1468 = vsyncpa [#allocation4], 1 }
 0x164   :  { %1469 = vsyncpa [#allocation5], 1 }

</bundles_post_ra>
